<compile_context>
chip_gen: v7x
topology: tpu7x:2x2x1
jax: 0.10.0
libtpu: 0.0.40
codegen_flags: <defaults>
</compile_context>

<pallas_src>
import inspect

import jax
import jax.numpy as jnp
from jax.experimental import pallas as pl
from jax.experimental.pallas import tpu as pltpu

_LANE = 128


def _round_up(x, m):
    return (x + m - 1) // m * m


def _vmem_capacity_bytes():
    try:
        return int(pltpu.get_tpu_info().vmem_capacity_bytes)
    except Exception:
        return 128 << 20  # conservative default (v5e/v6e)


def _supports_pinned_buffer():
    if not hasattr(pl, "Buffered"):
        return False
    try:
        return "pipeline_mode" in inspect.signature(pl.BlockSpec).parameters
    except Exception:
        return False


def _tree_kernel(t1_ref, t2_ref, w_ref, b_ref, o_ref):
    """Fused ModuleTree evaluation for one (tile_rows, Hp) row tile."""
    t1 = t1_ref[...]                     # terminal 't1'  (tile, Hp)
    t2 = t2_ref[...]                     # terminal 't2'  (tile, Hp)

    # linear(t1) == t1 @ W.T + b  (W passed pre-transposed / block-diag packed)
    # NOTE: default matmul precision matches the XLA reference; pass
    # precision=lax.Precision.HIGHEST via jnp.dot here if strict f32 is needed.
    lin = jnp.dot(t1, w_ref[...], preferred_element_type=jnp.float32) + b_ref[...]

    t1f = t1.astype(jnp.float32)
    t2f = t2.astype(jnp.float32)
    s = lin + t2f                        # element_wise_sum(linear(t1), t2)
    p = t1f * t2f                        # element_wise_product(t1, t2)
    g = jax.nn.sigmoid(t2f)              # blending gate
    # blending(s, p, t2) = g*s + (1-g)*p == p + g*(s - p)   (fewer VALU ops)
    o_ref[...] = (p + g * (s - p)).astype(o_ref.dtype)


def module_tree_forward(t1, t2, weight, bias, *, tile_rows=2048,
                        input_dtype=None, out_dtype=None, pack_lanes=_LANE):
    """Evaluate the ModuleTree on input_dict = {'t1': t1, 't2': t2}.

    t1, t2 : (B, S, H)
    weight : (H, H)  nn.Linear weight, PyTorch (out_features, in_features) layout
    bias   : (H,)
    tile_rows   : packed-row tile (multiple of 16); sweep 2048..8192
    input_dtype : kernel input dtype.  For the bf16 path pass ALREADY-bf16
                  tensors (then no wrapper cast pass is emitted); a mismatching
                  dtype here costs one extra HBM read+write of both inputs.
    out_dtype   : defaults to input_dtype (bf16 in -> bf16 out).
    pack_lanes  : lane-pack width (128; try 256 on v6e/v7x to feed the full
                  256-wide MXU -- mem-bound, so a small/free win at best).
    """
    B, S, H = t1.shape
    M = B * S
    if input_dtype is None:
        input_dtype = t1.dtype
    if out_dtype is None:
        out_dtype = input_dtype
    assert tile_rows % 16 == 0, "tile_rows must be a multiple of 16"
    assert pack_lanes % _LANE == 0

    t1f = t1.reshape(M, H)               # row-major reshape: free
    t2f = t2.reshape(M, H)
    wt = weight.T                        # (in, out): kernel computes x @ wt == x @ W.T

    # ---- lane packing of the hidden axis (no extra HBM passes) ----
    if H % _LANE == 0:
        # Already lane-dense.
        P, Hp = 1, H
        w_p, b_p = wt, bias
    elif pack_lanes % H == 0 and M % (pack_lanes // H) == 0:
        # Pack P consecutive rows side-by-side along the lane axis (free
        # row-major reshape) and use a block-diagonal weight: same HBM bytes,
        # full-width vregs & unmasked stores.
        P = pack_lanes // H
        Hp = pack_lanes
        w_p = jnp.kron(jnp.eye(P, dtype=wt.dtype), wt)        # (Hp, Hp) block-diag
        b_p = jnp.tile(bias, P)
        t1f = t1f.reshape(M // P, Hp)
        t2f = t2f.reshape(M // P, Hp)
    else:
        # Fallback: keep the native H as a full-extent last dim.  Stores are
        # lane-masked, but there is NO wrapper-side padding pass on the inputs.
        # TODO(synk): lane-pack the general case with an in-kernel gather if a
        # non-power-of-two H ever shows up on the hot path.
        P, Hp = 1, H
        w_p, b_p = wt, bias

    # ---- row tiling: no row padding of the inputs ----
    Mp = M // P                          # packed rows (exact by construction)
    # Aim for >=2 grid steps so dimension_semantics=("parallel",) can shard
    # across both v7x TensorCores; harmless on single-TC v5e/v6e.
    desired = min(tile_rows, _round_up(pl.cdiv(Mp, 2), 16))
    if desired >= Mp:
        t_rows = Mp                      # single block == full array extent
        grid_steps = 1
    else:
        t_rows = desired                 # multiple of 16 (>= 8 sublanes)
        grid_steps = pl.cdiv(Mp, t_rows)
    # Output is rounded up to whole blocks so output DMAs never go OOB; the
    # ragged last *input* block relies on Pallas-clipped OOB reads (garbage
    # rows are row-local and sliced off below).
    Mp_pad = grid_steps * t_rows

    if t1f.dtype != input_dtype:
        # Extra HBM pass -- callers on the bf16 path should pass bf16 tensors.
        t1f = t1f.astype(input_dtype)
    if t2f.dtype != input_dtype:
        t2f = t2f.astype(input_dtype)
    w_p = w_p.astype(input_dtype)
    b_p = b_p.astype(jnp.float32).reshape(1, Hp)

    isz = jnp.dtype(input_dtype).itemsize
    osz = jnp.dtype(out_dtype).itemsize

    # Pin the grid-invariant weight/bias to a single buffer when the weight is
    # big enough to matter (large-H fallback on v7x's 64 MiB VMEM).
    pin = _supports_pinned_buffer() and (Hp * Hp * isz >= (1 << 20))

    def _resident_spec(shape):
        if pin:
            return pl.BlockSpec(shape, lambda i: (0, 0),
                                pipeline_mode=pl.Buffered(1))
        return pl.BlockSpec(shape, lambda i: (0, 0))

    n_wbuf = 1 if pin else 2

    # ---- VMEM budget: double-buffered row tiles + resident weight/bias
    #      + headroom for the f32 elementwise intermediates (lin/s/p/g). ----
    need = (2 * 2 * t_rows * Hp * isz        # t1, t2 tiles (x2 buffers)
            + 2 * t_rows * Hp * osz          # out tile (x2 buffers)
            + n_wbuf * Hp * Hp * isz         # weight
            + 2 * Hp * 4                     # bias
            + 4 * t_rows * Hp * 4)           # f32 intermediates headroom
    phys = _vmem_capacity_bytes()
    cap = min((48 << 20) if phys >= (96 << 20) else (32 << 20), phys // 2)
    vmem_limit = int(min(cap, max(32 << 20, need)))

    cost = pl.CostEstimate(
        flops=2 * Mp * Hp * Hp + 8 * Mp * Hp,
        transcendentals=Mp * Hp,
        bytes_accessed=Mp * Hp * (2 * isz + osz) + Hp * Hp * isz + Hp * 4,
    )

    out = pl.pallas_call(
        _tree_kernel,
        out_shape=jax.ShapeDtypeStruct((Mp_pad, Hp), out_dtype),
        grid_spec=pltpu.PrefetchScalarGridSpec(
            num_scalar_prefetch=0,
            grid=(grid_steps,),
            in_specs=[
                pl.BlockSpec((t_rows, Hp), lambda i: (i, 0)),   # t1 row tile
                pl.BlockSpec((t_rows, Hp), lambda i: (i, 0)),   # t2 row tile
                _resident_spec((Hp, Hp)),                       # W^T (resident)
                _resident_spec((1, Hp)),                        # bias (resident)
            ],
            out_specs=pl.BlockSpec((t_rows, Hp), lambda i: (i, 0)),
        ),
        compiler_params=pltpu.CompilerParams(
            dimension_semantics=("parallel",),
            vmem_limit_bytes=vmem_limit),
        cost_estimate=cost,
    )(t1f, t2f, w_p, b_p)

    # Unpack: drop the (rare) padded tail rows, then a free row-major reshape
    # back to (B, S, H).  When the grid divides exactly, the slice is identity.
    return out[:Mp].reshape(B, S, H)


def _reference(t1, t2, weight, bias):
    lin = jnp.einsum("bsh,oh->bso", t1, weight) + bias
    s = lin + t2
    p = t1 * t2
    g = jax.nn.sigmoid(t2)
    return g * s + (1.0 - g) * p


if __name__ == "__main__":
    key = jax.random.PRNGKey(0)
    k1, k2, kw, kb = jax.random.split(key, 4)

    # --- small shapes consistent with the module (batch=2, seq=8, hidden=32) ---
    B, S, H = 2, 8, 32
    t1 = jax.random.normal(k1, (B, S, H), dtype=jnp.float32)
    t2 = jax.random.normal(k2, (B, S, H), dtype=jnp.float32)
    weight = jax.random.normal(kw, (H, H), dtype=jnp.float32) / jnp.sqrt(H)
    bias = jax.random.normal(kb, (H,), dtype=jnp.float32) * 0.01

    out = jax.block_until_ready(module_tree_forward(t1, t2, weight, bias))
    ref = _reference(t1, t2, weight, bias)
    assert out.shape == (B, S, H)
    assert jnp.allclose(out, ref, atol=1e-4, rtol=1e-4), "f32 small mismatch"

    # --- larger run: exercises the multi-step "parallel" grid (2 TCs on v7x) ---
    B2, S2 = 2, 2048
    t1b = jax.random.normal(k1, (B2, S2, H), dtype=jnp.float32)
    t2b = jax.random.normal(k2, (B2, S2, H), dtype=jnp.float32)
    out_b = jax.block_until_ready(module_tree_forward(t1b, t2b, weight, bias))
    ref_b = _reference(t1b, t2b, weight, bias)
    assert jnp.allclose(out_b, ref_b, atol=1e-4, rtol=1e-4), "f32 tiled mismatch"

    # --- ragged row count: partial last block (clipped OOB reads, sliced out) ---
    B3, S3 = 2, 1100
    t1r = jax.random.normal(k1, (B3, S3, H), dtype=jnp.float32)
    t2r = jax.random.normal(k2, (B3, S3, H), dtype=jnp.float32)
    out_r = jax.block_until_ready(module_tree_forward(t1r, t2r, weight, bias))
    ref_r = _reference(t1r, t2r, weight, bias)
    assert jnp.allclose(out_r, ref_r, atol=1e-4, rtol=1e-4), "f32 ragged mismatch"

    # --- end-to-end bf16 path: caller passes bf16 tensors, output is bf16 ---
    t1bf = t1b.astype(jnp.bfloat16)
    t2bf = t2b.astype(jnp.bfloat16)
    wbf = weight.astype(jnp.bfloat16)
    out_bf = jax.block_until_ready(module_tree_forward(t1bf, t2bf, wbf, bias))
    assert out_bf.dtype == jnp.bfloat16
    ref_bf = _reference(t1bf.astype(jnp.float32), t2bf.astype(jnp.float32),
                        wbf.astype(jnp.float32), bias)
    assert jnp.allclose(out_bf.astype(jnp.float32), ref_bf,
                        atol=3e-2, rtol=3e-2), "bf16 mismatch"

    # --- fallback path: H neither divides nor is divided by 128 ---
    H4 = 48
    t1c = jax.random.normal(k1, (B, S, H4), dtype=jnp.float32)
    t2c = jax.random.normal(k2, (B, S, H4), dtype=jnp.float32)
    w4 = jax.random.normal(kw, (H4, H4), dtype=jnp.float32) / jnp.sqrt(H4)
    b4 = jax.random.normal(kb, (H4,), dtype=jnp.float32) * 0.01
    out_c = jax.block_until_ready(module_tree_forward(t1c, t2c, w4, b4))
    ref_c = _reference(t1c, t2c, w4, b4)
    assert jnp.allclose(out_c, ref_c, atol=2e-3, rtol=2e-3), "fallback mismatch"

    print("KERNEL_OK")
</pallas_src>

<mosaic_0001>
module attributes {stable_mosaic.version = 11 : i64} {
  func.func @_tree_kernel(%arg0: i32, %arg1: memref<4x128xf32, #tpu.memory_space<vmem>>, %arg2: memref<4x128xf32, #tpu.memory_space<vmem>>, %arg3: memref<128x128xf32, #tpu.memory_space<vmem>>, %arg4: memref<1x128xf32, #tpu.memory_space<vmem>>, %arg5: memref<4x128xf32, #tpu.memory_space<vmem>>) attributes {dimension_semantics = [#tpu.dimension_semantics<parallel>], iteration_bounds = array<i64: 1>, scalar_prefetch = 0 : i64, scratch_operands = 0 : i64, tpu.core_type = #tpu.core_type<tc>, window_params = [{transform_indices = @transform_0, window_bounds = array<i64: 4, 128>}, {transform_indices = @transform_1, window_bounds = array<i64: 4, 128>}, {pipeline_mode = #tpu.pipeline_mode<synchronous>, transform_indices = @transform_2, window_bounds = array<i64: 128, 128>}, {pipeline_mode = #tpu.pipeline_mode<synchronous>, transform_indices = @transform_3, window_bounds = array<i64: 1, 128>}, {transform_indices = @transform_4, window_bounds = array<i64: 4, 128>}]} {
    %c0 = arith.constant 0 : index
    %c0_0 = arith.constant 0 : index
    %0 = vector.load %arg1[%c0, %c0_0] : memref<4x128xf32, #tpu.memory_space<vmem>>, vector<4x128xf32>
    %c0_1 = arith.constant 0 : index
    %c0_2 = arith.constant 0 : index
    %1 = vector.load %arg2[%c0_1, %c0_2] : memref<4x128xf32, #tpu.memory_space<vmem>>, vector<4x128xf32>
    %c0_3 = arith.constant 0 : index
    %c0_4 = arith.constant 0 : index
    %2 = vector.load %arg3[%c0_3, %c0_4] : memref<128x128xf32, #tpu.memory_space<vmem>>, vector<128x128xf32>
    %cst = arith.constant dense<0.000000e+00> : vector<4x128xf32>
    %3 = tpu.matmul %0, %2, %cst {dimension_numbers = #tpu.dot_dimension_numbers<[1], [0], [0], [1], [0, 0, 1, 1], [], []>} : vector<4x128xf32>, vector<128x128xf32>, vector<4x128xf32> -> vector<4x128xf32>
    %c0_5 = arith.constant 0 : index
    %c0_6 = arith.constant 0 : index
    %4 = vector.load %arg4[%c0_5, %c0_6] : memref<1x128xf32, #tpu.memory_space<vmem>>, vector<1x128xf32>
    %5 = vector.broadcast %4 : vector<1x128xf32> to vector<4x128xf32>
    %6 = arith.addf %3, %5 : vector<4x128xf32>
    %7 = arith.addf %6, %1 : vector<4x128xf32>
    %8 = arith.mulf %0, %1 : vector<4x128xf32>
    %9 = arith.negf %1 : vector<4x128xf32>
    %10 = math.exp %9 : vector<4x128xf32>
    %cst_7 = arith.constant 1.000000e+00 : f32
    %11 = vector.broadcast %cst_7 : f32 to vector<4x128xf32>
    %12 = arith.addf %11, %10 : vector<4x128xf32>
    %13 = arith.divf %11, %12 : vector<4x128xf32>
    %14 = arith.subf %7, %8 : vector<4x128xf32>
    %15 = arith.mulf %13, %14 : vector<4x128xf32>
    %16 = arith.addf %8, %15 : vector<4x128xf32>
    %c0_8 = arith.constant 0 : index
    %c0_9 = arith.constant 0 : index
    %17 = vector.load %arg5[%c0_8, %c0_9] : memref<4x128xf32, #tpu.memory_space<vmem>>, vector<4x128xf32>
    tpu.vector_store %arg5[%c0_8, %c0_9], %16 {strides = array<i32>} : memref<4x128xf32, #tpu.memory_space<vmem>>, vector<4x128xf32>,
    return
  }
  func.func @transform_0(%arg0: i32) -> (i32, i32) {
    %c0_i32 = arith.constant 0 : i32
    %c0_i32_0 = arith.constant 0 : i32
    return %arg0, %c0_i32 : i32, i32
  }
  func.func @transform_1(%arg0: i32) -> (i32, i32) {
    %c0_i32 = arith.constant 0 : i32
    %c0_i32_0 = arith.constant 0 : i32
    return %arg0, %c0_i32 : i32, i32
  }
  func.func @transform_2(%arg0: i32) -> (i32, i32) {
    %c0_i32 = arith.constant 0 : i32
    %c0_i32_0 = arith.constant 0 : i32
    %c0_i32_1 = arith.constant 0 : i32
    return %c0_i32, %c0_i32_0 : i32, i32
  }
  func.func @transform_3(%arg0: i32) -> (i32, i32) {
    %c0_i32 = arith.constant 0 : i32
    %c0_i32_0 = arith.constant 0 : i32
    %c0_i32_1 = arith.constant 0 : i32
    return %c0_i32, %c0_i32_0 : i32, i32
  }
  func.func @transform_4(%arg0: i32) -> (i32, i32) {
    %c0_i32 = arith.constant 0 : i32
    %c0_i32_0 = arith.constant 0 : i32
    return %arg0, %c0_i32 : i32, i32
  }
}

</mosaic_0001>

<bundles_post_ra>
// kernel: tpu_custom_call.1
= control target key start
LH: loop header
LB: loop body
LE: loop exit
PB: predicated region body
PF: predicated region fallthrough
CT: control target
= control target key end

     0   :  { %9 = vsyncpa [#allocation3], 0  ;;  %s448_s0 = inlined_call_operand.hbm [shape: f32[4,128], index: 0, kind: input, shape index: {}]   ;;  %s449_s1 = inlined_call_operand.hbm [shape: f32[4,128], index: 1, kind: input, shape index: {}]   ;;  %s450_s2 = inlined_call_operand.hbm [shape: f32[128,128], index: 2, kind: input, shape index: {}]   ;;  %s451_s3 = inlined_call_operand.vmem [shape: f32[1,128], index: 3, kind: input, shape index: {}]   ;;  %s452_s4 = inlined_call_operand.hbm [shape: f32[4,128], index: 4, kind: output, shape index: {}]  }
   0x1   :  { %10 = vsyncpa [#allocation6], 0 }
   0x2   :  { %11 = vsyncpa [#allocation4], 0  ;;  %s363_s15 = smov [#allocation5]   ;;  %s364_s17 = smov [#allocation2]  }
   0x3   :  { %s28_s16 = sshll.u32 %s363_s15, 4  ;;  %s18_s18 = sshll.u32 %s364_s17, 4  ;;  %s29_s16 = int_to_ptr.vmem [resolvable:$true] %s28_s16  ;;  %s19_s18 = int_to_ptr.vmem [resolvable:$true] %s18_s18 }
   0x4   :  { %s269_s21 = scalar_lea.hbm %s449_s1, 64 }
   0x5   :  { %p270_p0 = scmp.ne.s32.totalorder %s449_s1, %s269_s21  ;;  %p273_p1 = scmp.lt.u32.totalorder %s269_s21, %s449_s1 }
   0x7   :  { %p275_p2 = pnand %p273_p1, %p270_p0 }
   0x9   :  { %278 = shalt.err (!%p275_p2)
}
   0xa   :  { %s279_s26 = scalar_lea.vmem %s29_s16, 64  ;;  %p284_p4 = scmp.lt.s32.totalorder %s29_s16, %s29_s16 }
   0xb   :  { %p280_p3 = scmp.ne.s32.totalorder %s29_s16, %s279_s26  ;;  %p285_p5 = scmp.lt.s32.totalorder %s279_s26, %s279_s26 }
   0xd   :  { %p286_p6 = por %p285_p5, %p284_p4 }
   0xf   :  { %p287_p7 = pnand %p286_p6, %p280_p3 }
  0x11   :  { %290 = shalt.err (!%p287_p7)
}
  0x12   :  { %31 = dma.hbm_to_vmem [thread:$0]  %s449_s1, 64, %s29_s16, [#allocation6]  }
  0x13   :  { %s291_s5 = scalar_lea.hbm %s448_s0, 64 }
  0x14   :  { %p292_p8 = scmp.ne.s32.totalorder %s448_s0, %s291_s5  ;;  %p295_p9 = scmp.lt.u32.totalorder %s291_s5, %s448_s0 }
  0x16   :  { %p297_p10 = pnand %p295_p9, %p292_p8 }
  0x18   :  { %300 = shalt.err (!%p297_p10)
}
  0x19   :  { %s301_s10 = scalar_lea.vmem %s19_s18, 64  ;;  %p306_p12 = scmp.lt.s32.totalorder %s19_s18, %s19_s18 }
  0x1a   :  { %p302_p11 = scmp.ne.s32.totalorder %s19_s18, %s301_s10  ;;  %p307_p13 = scmp.lt.s32.totalorder %s301_s10, %s301_s10 }
  0x1c   :  { %p308_p0 = por %p307_p13, %p306_p12 }
  0x1e   :  { %p309_p1 = pnand %p308_p0, %p302_p11 }
  0x20   :  { %312 = shalt.err (!%p309_p1)
}
  0x21   :  { %21 = dma.hbm_to_vmem [thread:$0]  %s448_s0, 64, %s19_s18, [#allocation3]  }
  0x22   :  { %s365_s12 = smov [#allocation7]   ;;  %s313_s16 = scalar_lea.hbm %s450_s2, 2048 }
  0x23   :  { %s37_s13 = sshll.u32 %s365_s12, 4  ;;  %p314_p2 = scmp.ne.s32.totalorder %s450_s2, %s313_s16  ;;  %s38_s13 = int_to_ptr.vmem [resolvable:$true] %s37_s13 }
  0x24   :  { %p317_p3 = scmp.lt.u32.totalorder %s313_s16, %s450_s2 }
  0x26   :  { %p319_p4 = pnand %p317_p3, %p314_p2 }
  0x28   :  { %322 = shalt.err (!%p319_p4)
}
  0x29   :  { %s323_s22 = scalar_lea.vmem %s38_s13, 2048  ;;  %p328_p6 = scmp.lt.s32.totalorder %s38_s13, %s38_s13 }
  0x2a   :  { %p324_p5 = scmp.ne.s32.totalorder %s38_s13, %s323_s22  ;;  %p329_p7 = scmp.lt.s32.totalorder %s323_s22, %s323_s22 }
  0x2c   :  { %p330_p8 = por %p329_p7, %p328_p6 }
  0x2e   :  { %p331_p9 = pnand %p330_p8, %p324_p5 }
  0x30   :  { %334 = shalt.err (!%p331_p9)
}
  0x31   :  { %s366_s0 = smov 128   ;;  %s367_s18 = smov 8  }
  0x32   :  { %43 = dma.hbm_to_vmem [thread:$0]  %s450_s2, 2048, %s38_s13, [#allocation6], %s366_s0, %s366_s0, %s367_s18  }
  0x33   :  { %357 = dma.done.wait [#allocation3], 64  }
  0x34   :  { %358 = vsyncadd [#allocation3], 4294967232 }
  0x35   :  { %359 = dma.done.wait [#allocation6], 2112  }
  0x36   :  { %360 = vsyncadd [#allocation6], 4294965184  ;;  %v368_v0 = vmov 0.0|0.0   ;;  %vm369_vm0 = vmmov 0   ;;  %v370_v1 = vmov 0.0   ;;  %v57_v2 = vld [vmem:[#allocation7] sm:$0xff] }
  0x37   :  { %232 = vmatprep.subr.bf16.mxu0 %v368_v0  ;;  %229 = vmatprep.mubr.msk.f32.mxu0 %vm369_vm0, %v370_v1  ;;  %v58_v3 = vld [vmem:[#allocation7 + $0x8] sm:$0xff]  ;;  %v59_v4 = vld [vmem:[#allocation7 + $0x10] sm:$0xff]  ;;  %v60_v6 = vld [vmem:[#allocation7 + $0x18] sm:$0xff]  ;;  %s371_s26 = smov [#allocation8]  }
  0x38   :  { %v233_v5 = vpack.c.bf16 %v58_v3, %v57_v2  ;;  %v236_v7 = vpack.c.bf16 %v60_v6, %v59_v4  ;;  %v61_v8 = vld [vmem:[#allocation7 + $0x20] sm:$0xff]  ;;  %v62_v9 = vld [vmem:[#allocation7 + $0x28] sm:$0xff]  ;;  %v63_v11 = vld [vmem:[#allocation7 + $0x30] sm:$0xff]  ;;  %s168_s27 = sshll.u32 %s371_s26, 4  ;;  %s169_s27 = int_to_ptr.vmem [resolvable:$true] %s168_s27 }
  0x39   :  { %v239_v10 = vpack.c.bf16 %v62_v9, %v61_v8  ;;  %v64_v12 = vld [vmem:[#allocation7 + $0x38] sm:$0xff]  ;;  %v65_v14 = vld [vmem:[#allocation7 + $0x40] sm:$0xff]  ;;  %v66_v15 = vld [vmem:[#allocation7 + $0x48] sm:$0xff]  ;;  %s335_s28 = scalar_lea.vmem %s169_s27, 64  ;;  %p340_p11 = scmp.lt.s32.totalorder %s169_s27, %s169_s27 }
  0x3a   :  { %234 = vmatpush3.bf16.msra.mxu0 %v233_v5  ;;  %v242_v13 = vpack.c.bf16 %v64_v12, %v63_v11  ;;  %v245_v16 = vpack.c.bf16 %v66_v15, %v65_v14  ;;  %v67_v17 = vld [vmem:[#allocation7 + $0x50] sm:$0xff]  ;;  %v68_v18 = vld [vmem:[#allocation7 + $0x58] sm:$0xff]  ;;  %v69_v20 = vld [vmem:[#allocation7 + $0x60] sm:$0xff]  ;;  %p336_p10 = scmp.ne.s32.totalorder %s169_s27, %s335_s28  ;;  %p341_p12 = scmp.lt.s32.totalorder %s335_s28, %s335_s28 }
  0x3b   :  { %235 = vmatprep.subr.bf16.mxu0 %v368_v0  ;;  %v248_v19 = vpack.c.bf16 %v68_v18, %v67_v17  ;;  %v70_v21 = vld [vmem:[#allocation7 + $0x68] sm:$0xff]  ;;  %v71_v23 = vld [vmem:[#allocation7 + $0x70] sm:$0xff]  ;;  %v72_v24 = vld [vmem:[#allocation7 + $0x78] sm:$0xff] }
  0x3c   :  { %v251_v22 = vpack.c.bf16 %v70_v21, %v69_v20  ;;  %v254_v25 = vpack.c.bf16 %v72_v24, %v71_v23  ;;  %v55_v26 = vld [vmem:[#allocation2] sm:$0xf]  ;;  %v56_v27 = vld [vmem:[#allocation5] sm:$0xf]  ;;  %p342_p13 = por %p341_p12, %p340_p11 }
  0x3d   :  { %v179_v28 = vmul.f32 -1.442695, %v56_v27  ;;  %v178_v31 = vld [vmem:[%s451_s3] ss:$0 sm:$0xff]  ;;  %v151_v33 = vmul.f32 %v56_v27, %v55_v26 }
  0x3e   :  { %237 = vmatpush3.bf16.msra.mxu0 %v236_v7  ;;  %p343_p0 = pnand %p342_p13, %p336_p10 }
  0x3f   :  { %238 = vmatprep.subr.bf16.mxu0 %v368_v0  ;;  %265 = vpow2.f32 %v179_v28 }
  0x42   :  { %240 = vmatpush3.bf16.msra.mxu0 %v239_v10 }
  0x43   :  { %241 = vmatprep.subr.bf16.mxu0 %v368_v0 }
  0x46   :  { %243 = vmatpush3.bf16.msra.mxu0 %v242_v13 }
  0x47   :  { %244 = vmatprep.subr.bf16.mxu0 %v368_v0 }
  0x49   :  { %v266_v29 = vpop.eup %265 }
  0x4a   :  { %246 = vmatpush3.bf16.msra.mxu0 %v245_v16  ;;  %v155_v30 = vadd.f32 1.0, %v266_v29 }
  0x4b   :  { %247 = vmatprep.subr.bf16.mxu0 %v368_v0 }
  0x4c   :  { %267 = vrcp.f32 %v155_v30 }
  0x4e   :  { %249 = vmatpush3.bf16.msra.mxu0 %v248_v19 }
  0x4f   :  { %250 = vmatprep.subr.bf16.mxu0 %v368_v0 }
  0x52   :  { %252 = vmatpush3.bf16.msra.mxu0 %v251_v22 }
  0x53   :  { %253 = vmatprep.subr.bf16.mxu0 %v368_v0 }
  0x56   :  { %255 = vmatpush3.bf16.msra.mxu0 %v254_v25  ;;  %v268_v37 = vpop.eup %267 }
  0x59   :  { %230 = vmatmul.mubr.f32.vlgmr.msra.gmra.mrb[0].mxu0 %v55_v26 }
 0x12c   :  { %v146_v32 = vpop.f32.mrb[0].mxu0 }
 0x12d   :  { %v147_v34 = vadd.f32 %v178_v31, %v146_v32  ;;  %v231_v35 = vpop.f32.mrb[1].mxu0 }
 0x12f   :  { %v150_v36 = vadd.f32 %v147_v34, %v56_v27 }
 0x131   :  { %v158_v38 = vsub.f32 %v150_v36, %v151_v33 }
 0x133   :  { %v159_v39 = vmul.f32 %v268_v37, %v158_v38 }
 0x135   :  { %v160_v40 = vadd.f32 %v159_v39, %v151_v33 }
 0x137   :  { %161 = vst [vmem:[#allocation8] sm:$0xf] %v160_v40 }
 0x138   :  { %346 = shalt.err (!%p343_p0)
}
 0x139   :  { %s347_s30 = scalar_lea.hbm %s452_s4, 64 }
 0x13a   :  { %p348_p1 = scmp.ne.s32.totalorder %s452_s4, %s347_s30  ;;  %p351_p2 = scmp.lt.u32.totalorder %s347_s30, %s452_s4 }
 0x13c   :  { %p353_p3 = pnand %p351_p2, %p348_p1 }
 0x13e   :  { %356 = shalt.err (!%p353_p3)
}
 0x13f   :  { %171 = dma.vmem_to_hbm [thread:$0]  %s169_s27, 64, %s452_s4, [#allocation4]  }
 0x140   :  { %361 = dma.done.wait [#allocation4], 64  }
 0x141   :  { %362 = vsyncadd [#allocation4], 4294967232 }
 0x142   :  { %175 = vsyncpa [#allocation3], 1 }
 0x143   :  { %176 = vsyncpa [#allocation6], 1 }
 0x144   :  { %177 = vsyncpa [#allocation4], 1 }

</bundles_post_ra>
